<compile_context>
chip_gen: v5e
topology: v5e:2x2
jax: 0.10.0
libtpu: 0.0.40
codegen_flags: <defaults>
</compile_context>

<pallas_src>
import functools

import jax
import jax.numpy as jnp
from jax.experimental import pallas as pl
from jax.experimental.pallas import tpu as pltpu

LANE = 128


def _round_up(n, m):
    return ((n + m - 1) // m) * m


def _pad_to(a, shape):
    return jnp.pad(a, [(0, t - s) for s, t in zip(a.shape, shape)])


# ----------------------------------------------------------------------------
# Kernel 1: base model forward  (Linear -> ReLU -> Linear), lane-padded feats.
# ----------------------------------------------------------------------------
def _mlp_kernel(x_ref, w1_ref, b1_ref, w2_ref, b2_ref, o_ref, *, matmul_dtype):
    x = x_ref[...]
    h = jnp.dot(x.astype(matmul_dtype), w1_ref[...].astype(matmul_dtype),
                preferred_element_type=jnp.float32) + b1_ref[...]
    h = jnp.maximum(h, 0.0)                      # padded hidden lanes stay 0
    o = jnp.dot(h.astype(matmul_dtype), w2_ref[...].astype(matmul_dtype),
                preferred_element_type=jnp.float32) + b2_ref[...]
    o_ref[...] = o.astype(o_ref.dtype)           # full 128-lane unmasked store


def mlp_forward(x, w1, b1, w2, b2, *, d_out, block_b=512,
                matmul_dtype=jnp.bfloat16):
    B, d_in = x.shape
    hp = w1.shape[1]
    dop = w2.shape[1]
    tb = min(block_b, _round_up(B, 8))
    grid = (pl.cdiv(B, tb),)
    kernel = functools.partial(_mlp_kernel, matmul_dtype=matmul_dtype)
    out = pl.pallas_call(
        kernel,
        out_shape=jax.ShapeDtypeStruct((B, dop), x.dtype),
        grid=grid,
        in_specs=[
            pl.BlockSpec((tb, d_in), lambda i: (i, 0)),   # streamed over batch
            pl.BlockSpec((d_in, hp), lambda i: (0, 0)),   # resident weights
            pl.BlockSpec((1, hp), lambda i: (0, 0)),
            pl.BlockSpec((hp, dop), lambda i: (0, 0)),
            pl.BlockSpec((1, dop), lambda i: (0, 0)),
        ],
        out_specs=pl.BlockSpec((tb, dop), lambda i: (i, 0)),
        compiler_params=pltpu.CompilerParams(
            dimension_semantics=("parallel",)),
    )(x, w1, b1, w2, b2)
    return out[:, :d_out]


# ----------------------------------------------------------------------------
# Kernel 2: TaskEmbedding.forward (Linear -> ReLU -> LayerNorm), lane-padded.
# LayerNorm stats are over the real `d_valid` features only.
# ----------------------------------------------------------------------------
def _task_embed_kernel(x_ref, w_ref, b_ref, g_ref, beta_ref, o_ref, *,
                       d_valid, eps, matmul_dtype):
    x = x_ref[...]
    h = jnp.dot(x.astype(matmul_dtype), w_ref[...].astype(matmul_dtype),
                preferred_element_type=jnp.float32) + b_ref[...]
    h = jnp.maximum(h, 0.0)                      # padded lanes are exactly 0
    lane = jax.lax.broadcasted_iota(jnp.int32, h.shape, dimension=1)
    valid = lane < d_valid
    inv_d = 1.0 / d_valid
    mean = jnp.sum(h, axis=-1, keepdims=True) * inv_d        # pads contribute 0
    centered = h - mean
    var = jnp.sum(jnp.where(valid, centered * centered, 0.0),
                  axis=-1, keepdims=True) * inv_d            # biased variance
    xhat = centered * jax.lax.rsqrt(var + eps)
    # gamma is zero on padded lanes -> padded output columns are exactly 0.
    o_ref[...] = (xhat * g_ref[...] + beta_ref[...]).astype(o_ref.dtype)


def task_embedding_forward(x, w, b, gamma, beta, *, d_valid, block_b=512,
                           eps=1e-5, matmul_dtype=jnp.bfloat16):
    B, d_in = x.shape
    ep = w.shape[1]
    tb = min(block_b, _round_up(B, 8))
    grid = (pl.cdiv(B, tb),)
    kernel = functools.partial(_task_embed_kernel, d_valid=d_valid, eps=eps,
                               matmul_dtype=matmul_dtype)
    out = pl.pallas_call(
        kernel,
        out_shape=jax.ShapeDtypeStruct((B, ep), x.dtype),
        grid=grid,
        in_specs=[
            pl.BlockSpec((tb, d_in), lambda i: (i, 0)),
            pl.BlockSpec((d_in, ep), lambda i: (0, 0)),
            pl.BlockSpec((1, ep), lambda i: (0, 0)),
            pl.BlockSpec((1, ep), lambda i: (0, 0)),
            pl.BlockSpec((1, ep), lambda i: (0, 0)),
        ],
        out_specs=pl.BlockSpec((tb, ep), lambda i: (i, 0)),
        compiler_params=pltpu.CompilerParams(
            dimension_semantics=("parallel",)),
    )(x, w, b, gamma, beta)
    return out[:, :d_valid]


# ----------------------------------------------------------------------------
# Module wrapper (parameter construction / padding is plain JAX glue)
# ----------------------------------------------------------------------------
class MAMLForCausalDiscoveryPallas:
    def __init__(self, key, d_in=16, hidden=32, d_out=16, embedding_dim=32,
                 block_b=512, matmul_dtype=jnp.bfloat16):
        self.d_out = d_out
        self.embedding_dim = embedding_dim
        self.block_b = block_b
        self.matmul_dtype = matmul_dtype

        hp = _round_up(hidden, LANE)
        dop = _round_up(d_out, LANE)
        ep = _round_up(embedding_dim, LANE)

        k1, k2, k3, k4, k5, k6 = jax.random.split(key, 6)
        s1 = 1.0 / jnp.sqrt(d_in)
        s2 = 1.0 / jnp.sqrt(hidden)
        se = 1.0 / jnp.sqrt(embedding_dim)

        # base model (2-layer MLP), weights stored [in, out], zero-padded to
        # 128 output lanes so kernel stores are lane-dense.
        w1 = jax.random.uniform(k1, (d_in, hidden), jnp.float32, -s1, s1)
        b1 = jax.random.uniform(k2, (1, hidden), jnp.float32, -s1, s1)
        w2 = jax.random.uniform(k3, (hidden, d_out), jnp.float32, -s2, s2)
        b2 = jax.random.uniform(k4, (1, d_out), jnp.float32, -s2, s2)
        self.w1 = _pad_to(w1, (d_in, hp))
        self.b1 = _pad_to(b1, (1, hp))
        self.w2 = _pad_to(w2, (hp, dop))
        self.b2 = _pad_to(b2, (1, dop))

        # task embedding transform: Linear(32,32) -> ReLU -> LayerNorm(32)
        we = jax.random.uniform(k5, (embedding_dim, embedding_dim),
                                jnp.float32, -se, se)
        be = jax.random.uniform(k6, (1, embedding_dim), jnp.float32, -se, se)
        self.we = _pad_to(we, (embedding_dim, ep))
        self.be = _pad_to(be, (1, ep))
        self.gamma = _pad_to(jnp.ones((1, embedding_dim), jnp.float32), (1, ep))
        self.beta = jnp.zeros((1, ep), jnp.float32)

    def forward(self, x, graph=None, adapted_model=None):
        if adapted_model is not None:
            return adapted_model(x)
        # TODO(synk): graph path needs TaskEmbedding.encode_graph (a GNN over a
        # CausalGraph) and MAML inner/outer-loop adaptation; those are training
        # / graph-structured procedures, not a forward tensor kernel.  The
        # model prediction itself is identical in all branches of the spec.
        return mlp_forward(x, self.w1, self.b1, self.w2, self.b2,
                           d_out=self.d_out, block_b=self.block_b,
                           matmul_dtype=self.matmul_dtype)

    def task_embed(self, x):
        return task_embedding_forward(x, self.we, self.be, self.gamma,
                                      self.beta, d_valid=self.embedding_dim,
                                      block_b=self.block_b,
                                      matmul_dtype=self.matmul_dtype)


if __name__ == "__main__":
    key = jax.random.PRNGKey(0)
    k_param, k_x, k_e = jax.random.split(key, 3)

    module = MAMLForCausalDiscoveryPallas(k_param, d_in=16, hidden=32,
                                          d_out=16, embedding_dim=32)

    # forward(x): x is [batch, input_dim]
    x = jax.random.normal(k_x, (8, 16), jnp.float32)
    out = module.forward(x)
    jax.block_until_ready(out)
    assert out.shape == (8, 16)

    # TaskEmbedding.forward(x): x is [batch, embedding_dim]
    xe = jax.random.normal(k_e, (8, 32), jnp.float32)
    emb = module.task_embed(xe)
    jax.block_until_ready(emb)
    assert emb.shape == (8, 32)

    print("KERNEL_OK")
</pallas_src>

<mosaic_0001>
module attributes {stable_mosaic.version = 11 : i64} {
  func.func @_mlp_kernel(%arg0: i32, %arg1: memref<8x16xf32, #tpu.memory_space<vmem>>, %arg2: memref<16x128xf32, #tpu.memory_space<vmem>>, %arg3: memref<1x128xf32, #tpu.memory_space<vmem>>, %arg4: memref<128x128xf32, #tpu.memory_space<vmem>>, %arg5: memref<1x128xf32, #tpu.memory_space<vmem>>, %arg6: memref<8x128xf32, #tpu.memory_space<vmem>>) attributes {dimension_semantics = [#tpu.dimension_semantics<parallel>], iteration_bounds = array<i64: 1>, scalar_prefetch = 0 : i64, scratch_operands = 0 : i64, tpu.core_type = #tpu.core_type<tc>, window_params = [{transform_indices = @transform_0, window_bounds = array<i64: 8, 16>}, {pipeline_mode = #tpu.pipeline_mode<synchronous>, transform_indices = @transform_1, window_bounds = array<i64: 16, 128>}, {pipeline_mode = #tpu.pipeline_mode<synchronous>, transform_indices = @transform_2, window_bounds = array<i64: 1, 128>}, {pipeline_mode = #tpu.pipeline_mode<synchronous>, transform_indices = @transform_3, window_bounds = array<i64: 128, 128>}, {pipeline_mode = #tpu.pipeline_mode<synchronous>, transform_indices = @transform_4, window_bounds = array<i64: 1, 128>}, {transform_indices = @transform_5, window_bounds = array<i64: 8, 128>}]} {
    %c0 = arith.constant 0 : index
    %c0_0 = arith.constant 0 : index
    %0 = vector.load %arg1[%c0, %c0_0] : memref<8x16xf32, #tpu.memory_space<vmem>>, vector<8x16xf32>
    %1 = arith.truncf %0 : vector<8x16xf32> to vector<8x16xbf16>
    %c0_1 = arith.constant 0 : index
    %c0_2 = arith.constant 0 : index
    %2 = vector.load %arg2[%c0_1, %c0_2] : memref<16x128xf32, #tpu.memory_space<vmem>>, vector<16x128xf32>
    %3 = arith.truncf %2 : vector<16x128xf32> to vector<16x128xbf16>
    %cst = arith.constant dense<0.000000e+00> : vector<8x128xf32>
    %4 = tpu.matmul %1, %3, %cst {dimension_numbers = #tpu.dot_dimension_numbers<[1], [0], [0], [1], [0, 0, 1, 1], [], []>} : vector<8x16xbf16>, vector<16x128xbf16>, vector<8x128xf32> -> vector<8x128xf32>
    %c0_3 = arith.constant 0 : index
    %c0_4 = arith.constant 0 : index
    %5 = vector.load %arg3[%c0_3, %c0_4] : memref<1x128xf32, #tpu.memory_space<vmem>>, vector<1x128xf32>
    %6 = vector.broadcast %5 : vector<1x128xf32> to vector<8x128xf32>
    %7 = arith.addf %4, %6 : vector<8x128xf32>
    %cst_5 = arith.constant 0.000000e+00 : f32
    %8 = vector.broadcast %cst_5 : f32 to vector<8x128xf32>
    %9 = arith.maximumf %7, %8 : vector<8x128xf32>
    %10 = arith.truncf %9 : vector<8x128xf32> to vector<8x128xbf16>
    %c0_6 = arith.constant 0 : index
    %c0_7 = arith.constant 0 : index
    %11 = vector.load %arg4[%c0_6, %c0_7] : memref<128x128xf32, #tpu.memory_space<vmem>>, vector<128x128xf32>
    %12 = arith.truncf %11 : vector<128x128xf32> to vector<128x128xbf16>
    %cst_8 = arith.constant dense<0.000000e+00> : vector<8x128xf32>
    %13 = tpu.matmul %10, %12, %cst_8 {dimension_numbers = #tpu.dot_dimension_numbers<[1], [0], [0], [1], [0, 0, 1, 1], [], []>} : vector<8x128xbf16>, vector<128x128xbf16>, vector<8x128xf32> -> vector<8x128xf32>
    %c0_9 = arith.constant 0 : index
    %c0_10 = arith.constant 0 : index
    %14 = vector.load %arg5[%c0_9, %c0_10] : memref<1x128xf32, #tpu.memory_space<vmem>>, vector<1x128xf32>
    %15 = vector.broadcast %14 : vector<1x128xf32> to vector<8x128xf32>
    %16 = arith.addf %13, %15 : vector<8x128xf32>
    %c0_11 = arith.constant 0 : index
    %c0_12 = arith.constant 0 : index
    %17 = vector.load %arg6[%c0_11, %c0_12] : memref<8x128xf32, #tpu.memory_space<vmem>>, vector<8x128xf32>
    tpu.vector_store %arg6[%c0_11, %c0_12], %16 {strides = array<i32>} : memref<8x128xf32, #tpu.memory_space<vmem>>, vector<8x128xf32>,
    return
  }
  func.func @transform_0(%arg0: i32) -> (i32, i32) {
    %c0_i32 = arith.constant 0 : i32
    %c0_i32_0 = arith.constant 0 : i32
    return %arg0, %c0_i32 : i32, i32
  }
  func.func @transform_1(%arg0: i32) -> (i32, i32) {
    %c0_i32 = arith.constant 0 : i32
    %c0_i32_0 = arith.constant 0 : i32
    %c0_i32_1 = arith.constant 0 : i32
    return %c0_i32, %c0_i32_0 : i32, i32
  }
  func.func @transform_2(%arg0: i32) -> (i32, i32) {
    %c0_i32 = arith.constant 0 : i32
    %c0_i32_0 = arith.constant 0 : i32
    %c0_i32_1 = arith.constant 0 : i32
    return %c0_i32, %c0_i32_0 : i32, i32
  }
  func.func @transform_3(%arg0: i32) -> (i32, i32) {
    %c0_i32 = arith.constant 0 : i32
    %c0_i32_0 = arith.constant 0 : i32
    %c0_i32_1 = arith.constant 0 : i32
    return %c0_i32, %c0_i32_0 : i32, i32
  }
  func.func @transform_4(%arg0: i32) -> (i32, i32) {
    %c0_i32 = arith.constant 0 : i32
    %c0_i32_0 = arith.constant 0 : i32
    %c0_i32_1 = arith.constant 0 : i32
    return %c0_i32, %c0_i32_0 : i32, i32
  }
  func.func @transform_5(%arg0: i32) -> (i32, i32) {
    %c0_i32 = arith.constant 0 : i32
    %c0_i32_0 = arith.constant 0 : i32
    return %arg0, %c0_i32 : i32, i32
  }
}

</mosaic_0001>

<bundles_post_ra>
// kernel: tpu_custom_call.1
= control target key start
LH: loop header
LB: loop body
LE: loop exit
PB: predicated region body
PF: predicated region fallthrough
CT: control target
= control target key end

     0   :  { %10 = vsyncpa [#allocation3], 0  ;;  %s320_s0 = inlined_call_operand.hbm [shape: f32[8,16], index: 0, kind: input, shape index: {}]   ;;  %s321_s1 = inlined_call_operand.hbm [shape: f32[16,128], index: 1, kind: input, shape index: {}]   ;;  %s322_s2 = inlined_call_operand.vmem [shape: f32[1,128], index: 2, kind: input, shape index: {}]   ;;  %s323_s3 = inlined_call_operand.hbm [shape: f32[128,128], index: 3, kind: input, shape index: {}]   ;;  %s324_s4 = inlined_call_operand.vmem [shape: f32[1,128], index: 4, kind: input, shape index: {}]   ;;  %s325_s5 = inlined_call_operand.hbm [shape: f32[8,128], index: 5, kind: output, shape index: {}]  }
   0x1   :  { %11 = vsyncpa [#allocation6], 0  ;;  %s28_s20 = sshll.u32 %s321_s1, 4  ;;  %s29_s20 = int_to_ptr.hbm [resolvable:$true] %s28_s20 }
   0x2   :  { %12 = vsyncpa [#allocation4], 0  ;;  %s266_s21 = smov [#allocation5]   ;;  %s18_s25 = sshll.u32 %s320_s0, 4  ;;  %s19_s25 = int_to_ptr.hbm [resolvable:$true] %s18_s25 }
   0x3   :  { %s30_s22 = sshll.u32 %s266_s21, 4  ;;  %s267_s26 = smov 128   ;;  %s31_s22 = int_to_ptr.vmem [resolvable:$true] %s30_s22 }
   0x4   :  { %s268_s27 = smov 8   ;;  %s269_s28 = smov [#allocation2]  }
   0x5   :  { %36 = dma.hbm_to_vmem [thread:$0]  %s29_s20, 256, %s31_s22, [#allocation6], %s267_s26, %s267_s26, %s268_s27  }
   0x6   :  { %s20_s29 = sshll.u32 %s269_s28, 4  ;;  %s43_s7 = sshll.u32 %s323_s3, 4  ;;  %s21_s29 = int_to_ptr.vmem [resolvable:$true] %s20_s29  ;;  %s44_s7 = int_to_ptr.hbm [resolvable:$true] %s43_s7 }
   0x7   :  { %23 = dma.hbm_to_vmem [thread:$0]  %s19_s25, 128, %s21_s29, [#allocation3]  }
   0x8   :  { %s270_s1 = smov [#allocation7]  }
   0x9   :  { %s45_s8 = sshll.u32 %s270_s1, 4  ;;  %s46_s8 = int_to_ptr.vmem [resolvable:$true] %s45_s8 }
   0xa   :  { %51 = dma.hbm_to_vmem [thread:$0]  %s44_s7, 2048, %s46_s8, [#allocation6], %s267_s26, %s267_s26, %s268_s27  }
   0xb   :  { %260 = dma.done.wait [#allocation3], 128  }
   0xc   :  { %261 = vsyncadd [#allocation3], 4294967168 }
   0xd   :  { %262 = dma.done.wait [#allocation6], 2304  }
   0xe   :  { %263 = vsyncadd [#allocation6], 4294964992  ;;  %v69_v0 = vld [vmem:[#allocation5] sm:$0xff]  ;;  %v70_v1 = vld [vmem:[#allocation5 + $0x8] sm:$0xff]  ;;  %vm76_vm0 = vcmask 130048   ;;  %s271_s11 = smov [#allocation8]  }
   0xf   :  { %v67_v2 = vld [vmem:[#allocation2] sm:$0xff]  ;;  %v71_v3 = vpack.c.bf16 %v70_v1, %v69_v0  ;;  %v109_v4 = vld [vmem:[#allocation7 + $0x70] sm:$0xff]  ;;  %v110_v5 = vld [vmem:[#allocation7 + $0x78] sm:$0xff]  ;;  %s142_s12 = sshll.u32 %s271_s11, 4  ;;  %s144_s15 = sshll.u32 %s325_s5, 4  ;;  %s143_s12 = int_to_ptr.vmem [resolvable:$true] %s142_s12  ;;  %s145_s15 = int_to_ptr.hbm [resolvable:$true] %s144_s15 }
  0x10   :  { %v107_v6 = vld [vmem:[#allocation7 + $0x60] sm:$0xff]  ;;  %v68_v7 = vpack.c.bf16 %v67_v2, %v67_v2  ;;  %v118_v8 = vpack.c.bf16 %v110_v5, %v109_v4  ;;  %v108_v9 = vld [vmem:[#allocation7 + $0x68] sm:$0xff]  ;;  %v105_v11 = vld [vmem:[#allocation7 + $0x50] sm:$0xff] }
  0x11   :  { %87 = vmatpush.bf16.msra.mxu0 %v71_v3  ;;  %v117_v10 = vpack.c.bf16 %v108_v9, %v107_v6  ;;  %v106_v12 = vld [vmem:[#allocation7 + $0x58] sm:$0xff]  ;;  %v103_v14 = vld [vmem:[#allocation7 + $0x40] sm:$0xff]  ;;  %v104_v15 = vld [vmem:[#allocation7 + $0x48] sm:$0xff] }
  0x12   :  { %123 = vmatpush.bf16.msra.mxu1 %v118_v8  ;;  %v116_v13 = vpack.c.bf16 %v106_v12, %v105_v11  ;;  %v115_v16 = vpack.c.bf16 %v104_v15, %v103_v14  ;;  %v101_v17 = vld [vmem:[#allocation7 + $0x30] sm:$0xff]  ;;  %v102_v18 = vld [vmem:[#allocation7 + $0x38] sm:$0xff]  ;;  %v99_v20 = vld [vmem:[#allocation7 + $0x20] sm:$0xff] }
  0x13   :  { %v114_v19 = vpack.c.bf16 %v102_v18, %v101_v17  ;;  %v100_v21 = vld [vmem:[#allocation7 + $0x28] sm:$0xff]  ;;  %v97_v23 = vld [vmem:[#allocation7 + $0x10] sm:$0xff]  ;;  %v98_v24 = vld [vmem:[#allocation7 + $0x18] sm:$0xff] }
  0x14   :  { %155 = vmatmul.msk.bf16.vlgmr.msra.gmra.mxu0 %vm76_vm0, %v68_v7  ;;  %v113_v22 = vpack.c.bf16 %v100_v21, %v99_v20  ;;  %v112_v25 = vpack.c.bf16 %v98_v24, %v97_v23  ;;  %v95_v26 = vld [vmem:[#allocation7] sm:$0xff]  ;;  %v96_v27 = vld [vmem:[#allocation7 + $0x8] sm:$0xff] }
  0x15   :  { %v111_v28 = vpack.c.bf16 %v96_v27, %v95_v26  ;;  %v162_v29 = vld [vmem:[%s322_s2] ss:$0 sm:$0xff] }
  0x16   :  { %124 = vmatpush.bf16.msra.mxu1 %v117_v10  ;;  %v163_v35 = vld [vmem:[%s324_s4] ss:$0 sm:$0xff] }
  0x1a   :  { %125 = vmatpush.bf16.msra.mxu1 %v116_v13 }
  0x1e   :  { %126 = vmatpush.bf16.msra.mxu1 %v115_v16 }
  0x22   :  { %127 = vmatpush.bf16.msra.mxu1 %v114_v19 }
  0x26   :  { %128 = vmatpush.bf16.msra.mxu1 %v113_v22 }
  0x2a   :  { %129 = vmatpush.bf16.msra.mxu1 %v112_v25 }
  0x2e   :  { %130 = vmatpush.bf16.msra.mxu1 %v111_v28 }
  0x91   :  { %v89_v30 = vpop.f32.mrf.mxu0 }
  0x92   :  { %v90_v31 = vadd.f32 %v162_v29, %v89_v30 }
  0x94   :  { %v93_v32 = vmax.f32 %v90_v31, 0.0 }
  0x96   :  { %v94_v33 = vpack.c.bf16 %v93_v32, %v93_v32 }
  0x98   :  { %131 = vmatmul.bf16.vlgmr.msra.gmra.mxu1 %v94_v33 }
  0x99   :  { %v91_v34 = vpop.f32.mrf.mxu0 }
 0x115   :  { %v132_v36 = vpop.f32.mrf.mxu1 }
 0x116   :  { %v133_v37 = vadd.f32 %v163_v35, %v132_v36 }
 0x118   :  { %136 = vst [vmem:[#allocation8] sm:$0xff] %v133_v37 }
 0x119   :  { %147 = dma.vmem_to_hbm [thread:$0]  %s143_s12, 128, %s145_s15, [#allocation4]  }
 0x11d   :  { %v134_v38 = vpop.f32.mrf.mxu1 }
 0x11e   :  { %264 = dma.done.wait [#allocation4], 128  }
 0x11f   :  { %265 = vsyncadd [#allocation4], 4294967168 }
 0x120   :  { %152 = vsyncpa [#allocation3], 1 }
 0x121   :  { %153 = vsyncpa [#allocation6], 1 }
 0x122   :  { %154 = vsyncpa [#allocation4], 1 }

</bundles_post_ra>
